<compile_context>
chip_gen: v7x
topology: tpu7x:2x2x1
jax: 0.10.0
libtpu: 0.0.40
codegen_flags: <defaults>
</compile_context>

<pallas_src>
import jax
import jax.numpy as jnp
from jax.experimental import pallas as pl
from jax.experimental.pallas import tpu as pltpu  # noqa: F401  (TPU backend)

# --- config mirroring SingleModel(args) at small synthetic sizes -------------
HIDDEN = 128            # C.HIDDEN_DIM[model]['normal']
N_CLASSES = 4           # args.n_classes
N_CLASSES_PARA = 2      # additional_cls head
B = 8                   # batch
S = 8                   # sequence length
INIT_RANGE = 0.02       # args.initializer_range
ADDITIONAL_CLS = True   # args.additional_cls
PAD_C = 128             # lane-dense padded logits width (shared by both heads)


# --- fused Pallas kernel: both heads, one launch -----------------------------
def _fused_heads_kernel(lh_ref, w1a_ref, b1a_ref, w1b_ref, b1b_ref,
                        w2c_ref, b2c_ref, out_ref):
    lh = lh_ref[...]                                  # [B, S, H] f32 (tiny)
    x0 = lh[:, 0, :].astype(jnp.bfloat16)             # token 0 -> classifier
    x1 = lh[:, 1, :].astype(jnp.bfloat16)             # token 1 -> classifier_para

    # First Linear + Tanh per head (bf16 MXU operands, f32 accumulation,
    # bias add / tanh kept in f32).
    h0 = jnp.tanh(jnp.dot(x0, w1a_ref[...],
                          preferred_element_type=jnp.float32) + b1a_ref[...])
    h1 = jnp.tanh(jnp.dot(x1, w1b_ref[...],
                          preferred_element_type=jnp.float32) + b1b_ref[...])
    # TODO(synk): nn.Dropout(p) is identity in eval mode; training-mode
    # stochastic dropout (pltpu.prng_seed/prng_random_bits) intentionally omitted.

    # Fused second-layer GEMM: stack the two hidden states along sublanes and
    # multiply by the lane-padded concatenated W2 -> one lane-dense store.
    h = jnp.concatenate([h0, h1], axis=0).astype(jnp.bfloat16)        # [2B, H]
    y = jnp.dot(h, w2c_ref[...],
                preferred_element_type=jnp.float32) + b2c_ref[...]    # [2B, 128]
    out_ref[...] = y.astype(out_ref.dtype)


def fused_classifier_heads(last_hidden, w1a, b1a, w1b, b1b, w2c, b2c):
    """last_hidden [B,S,H] f32 -> padded logits slab [2B, PAD_C] f32.

    Rows 0..B-1 hold head-A (classifier) results in lanes [0, C_A);
    rows B..2B-1 hold head-B (classifier_para) results in lanes [C_A, C_A+C_B).
    """
    b, s, h = last_hidden.shape
    flops = 2 * b * h * h * 2 + 2 * (2 * b) * h * PAD_C
    bytes_accessed = (last_hidden.size * 4
                      + (w1a.size + w1b.size + w2c.size) * 2
                      + (b1a.size + b1b.size + b2c.size) * 4
                      + 2 * b * PAD_C * 4)
    return pl.pallas_call(
        _fused_heads_kernel,
        out_shape=jax.ShapeDtypeStruct((2 * b, PAD_C), jnp.float32),
        in_specs=[
            pl.BlockSpec((b, s, h), lambda: (0, 0, 0)),   # last_hidden (slice in-kernel)
            pl.BlockSpec((h, h), lambda: (0, 0)),         # W1 classifier      [in, out] bf16
            pl.BlockSpec((1, h), lambda: (0, 0)),         # b1 classifier      f32
            pl.BlockSpec((h, h), lambda: (0, 0)),         # W1 classifier_para [in, out] bf16
            pl.BlockSpec((1, h), lambda: (0, 0)),         # b1 classifier_para f32
            pl.BlockSpec((h, PAD_C), lambda: (0, 0)),     # W2 concat, lane-padded, bf16
            pl.BlockSpec((1, PAD_C), lambda: (0, 0)),     # b2 concat, lane-padded, f32
        ],
        out_specs=pl.BlockSpec((2 * b, PAD_C), lambda: (0, 0)),
        cost_estimate=pl.CostEstimate(flops=flops,
                                      transcendentals=2 * b * h,
                                      bytes_accessed=bytes_accessed),
    )(last_hidden, w1a, b1a, w1b, b1b, w2c, b2c)


# --- parameter init matching SingleModel._init_weights -----------------------
def init_classifier(key, hidden, n_classes, std=INIT_RANGE):
    k1, k2 = jax.random.split(key)
    w1 = (jax.random.normal(k1, (hidden, hidden)) * std).astype(jnp.float32)
    b1 = jnp.zeros((1, hidden), jnp.float32)                 # bias zeroed
    w2 = (jax.random.normal(k2, (hidden, n_classes)) * std).astype(jnp.float32)
    b2 = jnp.zeros((1, n_classes), jnp.float32)              # bias zeroed
    return (w1, b1, w2, b2)


def pack_fused_params(cls_params, para_params):
    """Pre-pack both heads for the fused kernel (bf16 weights, padded W2/b2)."""
    w1a, b1a, w2a, b2a = cls_params
    w1b, b1b, w2b, b2b = para_params
    h = w1a.shape[0]
    ca, cb = w2a.shape[1], w2b.shape[1]
    w2c = jnp.zeros((h, PAD_C), jnp.float32)
    w2c = w2c.at[:, :ca].set(w2a).at[:, ca:ca + cb].set(w2b)
    b2c = jnp.zeros((1, PAD_C), jnp.float32)
    b2c = b2c.at[:, :ca].set(b2a).at[:, ca:ca + cb].set(b2b)
    return (w1a.astype(jnp.bfloat16), b1a,
            w1b.astype(jnp.bfloat16), b1b,
            w2c.astype(jnp.bfloat16), b2c, ca, cb)


# --- forward pass mirroring SingleModel.forward ------------------------------
def single_model_forward(last_hidden, params, additional_cls=ADDITIONAL_CLS):
    # TODO(synk): pretrained AutoModel backbone not translatable; `last_hidden`
    # stands in for outputs[0] of the transformer.
    cls_p = params["classifier"]
    para_p = params["classifier_para"] if additional_cls else cls_p
    w1a, b1a, w1b, b1b, w2c, b2c, ca, cb = pack_fused_params(cls_p, para_p)

    out = fused_classifier_heads(last_hidden, w1a, b1a, w1b, b1b, w2c, b2c)
    b = last_hidden.shape[0]
    logits = out[:b, :ca]                                    # [B, n_classes]
    logits_para = out[b:, ca:ca + cb] if additional_cls else None
    hidden = None  # config.model_type != 'dual'
    return logits, hidden, logits_para


# --- pure-JAX reference for correctness check --------------------------------
def _ref_head(x, w1, b1, w2, b2):
    return jnp.tanh(x @ w1 + b1) @ w2 + b2


if __name__ == "__main__":
    key = jax.random.PRNGKey(0)
    k_hidden, k_cls, k_para = jax.random.split(key, 3)

    last_hidden = jax.random.normal(k_hidden, (B, S, HIDDEN), dtype=jnp.float32)
    params = {
        "classifier": init_classifier(k_cls, HIDDEN, N_CLASSES),
        "classifier_para": init_classifier(k_para, HIDDEN, N_CLASSES_PARA),
    }

    logits, hidden, logits_para = single_model_forward(last_hidden, params)
    jax.block_until_ready((logits, logits_para))

    # correctness check vs pure-JAX f32 reference (bf16 MXU operands -> looser tol)
    ref_logits = _ref_head(last_hidden[:, 0], *params["classifier"])
    ref_para = _ref_head(last_hidden[:, 1], *params["classifier_para"])
    assert logits.shape == (B, N_CLASSES)
    assert logits_para.shape == (B, N_CLASSES_PARA)
    assert hidden is None
    assert jnp.allclose(logits, ref_logits, atol=1e-2, rtol=1e-2)
    assert jnp.allclose(logits_para, ref_para, atol=1e-2, rtol=1e-2)

    print("KERNEL_OK")
</pallas_src>

<mosaic_0001>
module attributes {stable_mosaic.version = 11 : i64} {
  func.func @_fused_heads_kernel(%arg0: memref<8x8x128xf32, #tpu.memory_space<vmem>>, %arg1: memref<128x128xbf16, #tpu.memory_space<vmem>>, %arg2: memref<1x128xf32, #tpu.memory_space<vmem>>, %arg3: memref<128x128xbf16, #tpu.memory_space<vmem>>, %arg4: memref<1x128xf32, #tpu.memory_space<vmem>>, %arg5: memref<128x128xbf16, #tpu.memory_space<vmem>>, %arg6: memref<1x128xf32, #tpu.memory_space<vmem>>, %arg7: memref<16x128xf32, #tpu.memory_space<vmem>>) attributes {dimension_semantics = [], scalar_prefetch = 0 : i64, scratch_operands = 0 : i64, tpu.core_type = #tpu.core_type<tc>} {
    %c0 = arith.constant 0 : index
    %c0_0 = arith.constant 0 : index
    %c0_1 = arith.constant 0 : index
    %0 = vector.load %arg0[%c0, %c0_0, %c0_1] : memref<8x8x128xf32, #tpu.memory_space<vmem>>, vector<8x8x128xf32>
    %1 = vector.extract_strided_slice %0 {offsets = [0, 0, 0], sizes = [8, 1, 128], strides = [1, 1, 1]} : vector<8x8x128xf32> to vector<8x1x128xf32>
    %2 = vector.shape_cast %1 : vector<8x1x128xf32> to vector<8x128xf32>
    %3 = arith.truncf %2 : vector<8x128xf32> to vector<8x128xbf16>
    %4 = vector.extract_strided_slice %0 {offsets = [0, 1, 0], sizes = [8, 1, 128], strides = [1, 1, 1]} : vector<8x8x128xf32> to vector<8x1x128xf32>
    %5 = vector.shape_cast %4 : vector<8x1x128xf32> to vector<8x128xf32>
    %6 = arith.truncf %5 : vector<8x128xf32> to vector<8x128xbf16>
    %c0_2 = arith.constant 0 : index
    %c0_3 = arith.constant 0 : index
    %7 = vector.load %arg1[%c0_2, %c0_3] : memref<128x128xbf16, #tpu.memory_space<vmem>>, vector<128x128xbf16>
    %cst = arith.constant dense<0.000000e+00> : vector<8x128xf32>
    %8 = tpu.matmul %3, %7, %cst {dimension_numbers = #tpu.dot_dimension_numbers<[1], [0], [0], [1], [0, 0, 1, 1], [], []>} : vector<8x128xbf16>, vector<128x128xbf16>, vector<8x128xf32> -> vector<8x128xf32>
    %c0_4 = arith.constant 0 : index
    %c0_5 = arith.constant 0 : index
    %9 = vector.load %arg2[%c0_4, %c0_5] : memref<1x128xf32, #tpu.memory_space<vmem>>, vector<1x128xf32>
    %10 = vector.broadcast %9 : vector<1x128xf32> to vector<8x128xf32>
    %11 = arith.addf %8, %10 : vector<8x128xf32>
    %12 = math.tanh %11 : vector<8x128xf32>
    %c0_6 = arith.constant 0 : index
    %c0_7 = arith.constant 0 : index
    %13 = vector.load %arg3[%c0_6, %c0_7] : memref<128x128xbf16, #tpu.memory_space<vmem>>, vector<128x128xbf16>
    %cst_8 = arith.constant dense<0.000000e+00> : vector<8x128xf32>
    %14 = tpu.matmul %6, %13, %cst_8 {dimension_numbers = #tpu.dot_dimension_numbers<[1], [0], [0], [1], [0, 0, 1, 1], [], []>} : vector<8x128xbf16>, vector<128x128xbf16>, vector<8x128xf32> -> vector<8x128xf32>
    %c0_9 = arith.constant 0 : index
    %c0_10 = arith.constant 0 : index
    %15 = vector.load %arg4[%c0_9, %c0_10] : memref<1x128xf32, #tpu.memory_space<vmem>>, vector<1x128xf32>
    %16 = vector.broadcast %15 : vector<1x128xf32> to vector<8x128xf32>
    %17 = arith.addf %14, %16 : vector<8x128xf32>
    %18 = math.tanh %17 : vector<8x128xf32>
    %19 = tpu.concatenate %12, %18 in 0 : vector<8x128xf32>, vector<8x128xf32> -> vector<16x128xf32>
    %20 = arith.truncf %19 : vector<16x128xf32> to vector<16x128xbf16>
    %c0_11 = arith.constant 0 : index
    %c0_12 = arith.constant 0 : index
    %21 = vector.load %arg5[%c0_11, %c0_12] : memref<128x128xbf16, #tpu.memory_space<vmem>>, vector<128x128xbf16>
    %cst_13 = arith.constant dense<0.000000e+00> : vector<16x128xf32>
    %22 = tpu.matmul %20, %21, %cst_13 {dimension_numbers = #tpu.dot_dimension_numbers<[1], [0], [0], [1], [0, 0, 1, 1], [], []>} : vector<16x128xbf16>, vector<128x128xbf16>, vector<16x128xf32> -> vector<16x128xf32>
    %c0_14 = arith.constant 0 : index
    %c0_15 = arith.constant 0 : index
    %23 = vector.load %arg6[%c0_14, %c0_15] : memref<1x128xf32, #tpu.memory_space<vmem>>, vector<1x128xf32>
    %24 = vector.broadcast %23 : vector<1x128xf32> to vector<16x128xf32>
    %25 = arith.addf %22, %24 : vector<16x128xf32>
    %c0_16 = arith.constant 0 : index
    %c0_17 = arith.constant 0 : index
    %26 = vector.load %arg7[%c0_16, %c0_17] : memref<16x128xf32, #tpu.memory_space<vmem>>, vector<16x128xf32>
    tpu.vector_store %arg7[%c0_16, %c0_17], %25 {strides = array<i32>} : memref<16x128xf32, #tpu.memory_space<vmem>>, vector<16x128xf32>,
    return
  }
}

</mosaic_0001>

<bundles_post_ra>
// kernel: tpu_custom_call.1
= control target key start
LH: loop header
LB: loop body
LE: loop exit
PB: predicated region body
PF: predicated region fallthrough
CT: control target
= control target key end

     0   :  { %12 = vsyncpa [#allocation3], 0  ;;  %s969_s0 = inlined_call_operand.hbm [shape: f32[8,8,128], index: 0, kind: input, shape index: {}]   ;;  %s970_s1 = inlined_call_operand.hbm [shape: bf16[128,128], index: 1, kind: input, shape index: {}]   ;;  %s971_s2 = inlined_call_operand.vmem [shape: f32[1,128], index: 2, kind: input, shape index: {}]   ;;  %s972_s3 = inlined_call_operand.hbm [shape: bf16[128,128], index: 3, kind: input, shape index: {}]   ;;  %s973_s4 = inlined_call_operand.vmem [shape: f32[1,128], index: 4, kind: input, shape index: {}]   ;;  %s974_s5 = inlined_call_operand.hbm [shape: bf16[128,128], index: 5, kind: input, shape index: {}]   ;;  %s975_s6 = inlined_call_operand.vmem [shape: f32[1,128], index: 6, kind: input, shape index: {}]   ;;  %s976_s7 = inlined_call_operand.hbm [shape: f32[16,128], index: 7, kind: output, shape index: {}]  }
   0x1   :  { %13 = vsyncpa [#allocation6], 0 }
   0x2   :  { %14 = vsyncpa [#allocation9], 0 }
   0x3   :  { %15 = vsyncpa [#allocation4], 0  ;;  %s783_s24 = smov [#allocation5]   ;;  %s665_s28 = scalar_lea.hbm %s970_s1, 1024 }
   0x4   :  { %s33_s25 = sshll.u32 %s783_s24, 4  ;;  %p666_p0 = scmp.ne.s32.totalorder %s970_s1, %s665_s28  ;;  %s34_s25 = int_to_ptr.vmem [resolvable:$true] %s33_s25 }
   0x5   :  { %p669_p1 = scmp.lt.u32.totalorder %s665_s28, %s970_s1 }
   0x7   :  { %p671_p2 = pnand %p669_p1, %p666_p0 }
   0x9   :  { %674 = shalt.err (!%p671_p2)
}
   0xa   :  { %s675_s10 = scalar_lea.vmem %s34_s25, 1024  ;;  %p680_p4 = scmp.lt.s32.totalorder %s34_s25, %s34_s25 }
   0xb   :  { %p676_p3 = scmp.ne.s32.totalorder %s34_s25, %s675_s10  ;;  %p681_p5 = scmp.lt.s32.totalorder %s675_s10, %s675_s10 }
   0xd   :  { %p682_p6 = por %p681_p5, %p680_p4 }
   0xf   :  { %p683_p7 = pnand %p682_p6, %p676_p3 }
  0x11   :  { %686 = shalt.err (!%p683_p7)
}
  0x12   :  { %s784_s11 = smov 64   ;;  %s785_s12 = smov 4  }
  0x13   :  { %39 = dma.hbm_to_vmem [thread:$0]  %s970_s1, 1024, %s34_s25, [#allocation6], %s784_s11, %s784_s11, %s785_s12  }
  0x14   :  { %s786_s15 = smov [#allocation2]   ;;  %s687_s19 = scalar_lea.hbm %s969_s0, 1024 }
  0x15   :  { %s21_s16 = sshll.u32 %s786_s15, 4  ;;  %p688_p8 = scmp.ne.s32.totalorder %s969_s0, %s687_s19  ;;  %s22_s16 = int_to_ptr.vmem [resolvable:$true] %s21_s16 }
  0x16   :  { %p691_p9 = scmp.lt.u32.totalorder %s687_s19, %s969_s0 }
  0x18   :  { %p693_p10 = pnand %p691_p9, %p688_p8 }
  0x1a   :  { %696 = shalt.err (!%p693_p10)
}
  0x1b   :  { %s697_s24 = scalar_lea.vmem %s22_s16, 1024  ;;  %p702_p12 = scmp.lt.s32.totalorder %s22_s16, %s22_s16 }
  0x1c   :  { %p698_p11 = scmp.ne.s32.totalorder %s22_s16, %s697_s24  ;;  %p703_p13 = scmp.lt.s32.totalorder %s697_s24, %s697_s24 }
  0x1e   :  { %p704_p0 = por %p703_p13, %p702_p12 }
  0x20   :  { %p705_p1 = pnand %p704_p0, %p698_p11 }
  0x22   :  { %708 = shalt.err (!%p705_p1)
}
  0x23   :  { %s787_s1 = smov 128   ;;  %s788_s25 = smov 8  }
  0x24   :  { %27 = dma.hbm_to_vmem [thread:$0]  %s969_s0, 1024, %s22_s16, [#allocation3], %s787_s1, %s787_s1, %s788_s25  }
  0x25   :  { %s789_s28 = smov [#allocation7]   ;;  %s790_s30 = smov [#allocation8]  }
  0x26   :  { %s47_s29 = sshll.u32 %s789_s28, 4  ;;  %s61_s8 = sshll.u32 %s790_s30, 4  ;;  %s48_s29 = int_to_ptr.vmem [resolvable:$true] %s47_s29  ;;  %s864_s8 = int_to_ptr.vmem [resolvable:$true] %s61_s8 }
  0x27   :  { %s709_s13 = scalar_lea.hbm %s972_s3, 1024 }
  0x28   :  { %p710_p2 = scmp.ne.s32.totalorder %s972_s3, %s709_s13  ;;  %p713_p3 = scmp.lt.u32.totalorder %s709_s13, %s972_s3 }
  0x2a   :  { %p715_p4 = pnand %p713_p3, %p710_p2 }
  0x2c   :  { %718 = shalt.err (!%p715_p4)
}
  0x2d   :  { %s719_s0 = scalar_lea.vmem %s48_s29, 1024  ;;  %p724_p6 = scmp.lt.s32.totalorder %s48_s29, %s48_s29 }
  0x2e   :  { %p720_p5 = scmp.ne.s32.totalorder %s48_s29, %s719_s0  ;;  %p725_p7 = scmp.lt.s32.totalorder %s719_s0, %s719_s0 }
  0x30   :  { %p726_p8 = por %p725_p7, %p724_p6 }
  0x32   :  { %p727_p9 = pnand %p726_p8, %p720_p5 }
  0x34   :  { %730 = shalt.err (!%p727_p9)
}
  0x35   :  { %53 = dma.hbm_to_vmem [thread:$0]  %s972_s3, 1024, %s48_s29, [#allocation6], %s784_s11, %s784_s11, %s785_s12  }
  0x36   :  { %s731_s22 = scalar_lea.hbm %s974_s5, 1024 }
  0x37   :  { %p732_p10 = scmp.ne.s32.totalorder %s974_s5, %s731_s22  ;;  %p735_p11 = scmp.lt.u32.totalorder %s731_s22, %s974_s5 }
  0x39   :  { %p737_p12 = pnand %p735_p11, %p732_p10 }
  0x3b   :  { %740 = shalt.err (!%p737_p12)
}
  0x3c   :  { %s741_s28 = scalar_lea.vmem %s864_s8, 1024  ;;  %p746_p0 = scmp.lt.s32.totalorder %s864_s8, %s864_s8 }
  0x3d   :  { %p742_p13 = scmp.ne.s32.totalorder %s864_s8, %s741_s28  ;;  %p747_p1 = scmp.lt.s32.totalorder %s741_s28, %s741_s28 }
  0x3f   :  { %p748_p2 = por %p747_p1, %p746_p0 }
  0x41   :  { %p749_p3 = pnand %p748_p2, %p742_p13 }
  0x43   :  { %752 = shalt.err (!%p749_p3)
}
  0x44   :  { %67 = dma.hbm_to_vmem [thread:$0]  %s974_s5, 1024, %s864_s8, [#allocation9], %s784_s11, %s784_s11, %s785_s12  }
  0x45   :  { %775 = dma.done.wait [#allocation3], 1024  }
  0x46   :  { %776 = vsyncadd [#allocation3], 4294966272 }
  0x47   :  { %777 = dma.done.wait [#allocation6], 2048  }
  0x48   :  { %778 = vsyncadd [#allocation6], 4294965248 }
  0x49   :  { %779 = dma.done.wait [#allocation9], 1024  }
  0x4a   :  { %780 = vsyncadd [#allocation9], 4294966272  ;;  %v791_v0 = vmov 0.0   ;;  %vm792_vm0 = vmmov 0   ;;  %v637_v1 = vld [vmem:[#allocation5] sm:$0xff]   ;;  %v639_v3 = vld [vmem:[#allocation5 + $0x8] sm:$0xff]  }
  0x4b   :  { %566 = vmatprep.subr.bf16.mxu0 %v791_v0  ;;  %586 = vmatprep.subr.bf16.mxu1 %v791_v0  ;;  %v638_v2 = vld [vmem:[#allocation7] sm:$0xff]   ;;  %v640_v4 = vld [vmem:[#allocation7 + $0x8] sm:$0xff]   ;;  %v641_v5 = vld [vmem:[#allocation5 + $0x10] sm:$0xff]   ;;  %vm139_vm1 = vcmask 1041409   ;;  %vm142_vm2 = vcmask 1042434   ;;  %vm145_vm3 = vcmask 1043459  }
  0x4c   :  { %582 = vmatprep.mubr.msk.bf16.mxu0 %vm792_vm0, %v791_v0  ;;  %602 = vmatprep.mubr.msk.bf16.mxu1 %vm792_vm0, %v791_v0  ;;  %v642_v6 = vld [vmem:[#allocation7 + $0x10] sm:$0xff]   ;;  %v643_v7 = vld [vmem:[#allocation5 + $0x18] sm:$0xff]   ;;  %v645_v9 = vld [vmem:[#allocation5 + $0x20] sm:$0xff]   ;;  %vm148_vm4 = vcmask 1044484   ;;  %vm151_vm5 = vcmask 1045509   ;;  %vm154_vm6 = vcmask 1046534  }
  0x4d   :  { %567 = vmatpush3.bf16.msra.mxu0 %v637_v1  ;;  %587 = vmatpush3.bf16.msra.mxu1 %v638_v2  ;;  %v644_v8 = vld [vmem:[#allocation7 + $0x18] sm:$0xff]   ;;  %v646_v10 = vld [vmem:[#allocation7 + $0x20] sm:$0xff]   ;;  %v647_v11 = vld [vmem:[#allocation5 + $0x28] sm:$0xff]   ;;  %vm157_vm7 = vcmask 1047559  }
  0x4e   :  { %568 = vmatprep.subr.bf16.mxu0 %v791_v0  ;;  %588 = vmatprep.subr.bf16.mxu1 %v791_v0  ;;  %v83_v12 = vld [vmem:[#allocation2] sm:$0xff]  ;;  %v84_v13 = vld [vmem:[#allocation2 + $0x8] sm:$0xff]  ;;  %v85_v14 = vld [vmem:[#allocation2 + $0x10] sm:$0xff] }
  0x4f   :  { %v86_v15 = vld [vmem:[#allocation2 + $0x18] sm:$0xff]  ;;  %v87_v16 = vld [vmem:[#allocation2 + $0x20] sm:$0xff]  ;;  %v88_v17 = vld [vmem:[#allocation2 + $0x28] sm:$0xff]  ;;  %v91_v18 = vpack.c.bf16 %v83_v12, %v83_v12  ;;  %v92_v19 = vpack.c.bf16 %v84_v13, %v84_v13  ;;  %v93_v20 = vpack.c.bf16 %v85_v14, %v85_v14 }
  0x50   :  { %v89_v21 = vld [vmem:[#allocation2 + $0x30] sm:$0xff]  ;;  %v90_v22 = vld [vmem:[#allocation2 + $0x38] sm:$0xff]  ;;  %v94_v23 = vpack.c.bf16 %v86_v15, %v86_v15  ;;  %v95_v24 = vpack.c.bf16 %v87_v16, %v87_v16  ;;  %v96_v25 = vpack.c.bf16 %v88_v17, %v88_v17  ;;  %v648_v26 = vld [vmem:[#allocation7 + $0x28] sm:$0xff]  }
  0x51   :  { %569 = vmatpush3.bf16.msra.mxu0 %v639_v3  ;;  %589 = vmatpush3.bf16.msra.mxu1 %v640_v4  ;;  %v97_v27 = vpack.c.bf16 %v89_v21, %v89_v21  ;;  %v98_v28 = vpack.c.bf16 %v90_v22, %v90_v22  ;;  %v130_v29 = vunpack.c.l.b16 %v91_v18  ;;  %v131_v30 = vunpack.c.l.b16 %v92_v19  ;;  %v649_v35 = vld [vmem:[#allocation5 + $0x30] sm:$0xff]   ;;  %v651_v49 = vld [vmem:[#allocation5 + $0x38] sm:$0xff]   ;;  %v657_v12 = vld [vmem:[#allocation8 + $0x20] sm:$0xff]  }
  0x52   :  { %570 = vmatprep.subr.bf16.mxu0 %v791_v0  ;;  %590 = vmatprep.subr.bf16.mxu1 %v791_v0  ;;  %v132_v31 = vunpack.c.l.b16 %v93_v20  ;;  %v133_v32 = vunpack.c.l.b16 %v94_v23  ;;  %v134_v33 = vunpack.c.l.b16 %v95_v24  ;;  %v135_v34 = vunpack.c.l.b16 %v96_v25  ;;  %v650_v44 = vld [vmem:[#allocation7 + $0x30] sm:$0xff]   ;;  %v652_v54 = vld [vmem:[#allocation7 + $0x38] sm:$0xff]   ;;  %v658_v13 = vld [vmem:[#allocation8 + $0x28] sm:$0xff]  }
  0x53   :  { %v136_v36 = vunpack.c.l.b16 %v97_v27  ;;  %v137_v37 = vunpack.c.l.b16 %v98_v28  ;;  %v138_v38 = vrot.slane %v131_v30, 7  ;;  %v273_v39 = vrot.slane %v130_v29, 1  ;;  %v659_v14 = vld [vmem:[#allocation8 + $0x30] sm:$0xff]   ;;  %v660_v15 = vld [vmem:[#allocation8 + $0x38] sm:$0xff]   ;;  %v512_v16 = vld [vmem:[%s971_s2] ss:$0 sm:$0xff] }
  0x54   :  { %v141_v40 = vrot.slane %v132_v31, 6  ;;  %v144_v41 = vrot.slane %v133_v32, 5  ;;  %v147_v42 = vrot.slane %v134_v33, 4  ;;  %v150_v43 = vrot.slane %v135_v34, 3  ;;  %v521_v17 = vld [vmem:[%s973_s4] ss:$0 sm:$0xff] }
  0x55   :  { %571 = vmatpush3.bf16.msra.mxu0 %v641_v5  ;;  %591 = vmatpush3.bf16.msra.mxu1 %v642_v6  ;;  %v140_v45 = vsel %vm139_vm1, %v138_v38, %v130_v29  ;;  %v153_v46 = vrot.slane %v136_v36, 2  ;;  %v156_v47 = vrot.slane %v137_v37, 1  ;;  %v274_v48 = vsel %vm139_vm1, %v131_v30, %v273_v39  ;;  %v653_v6 = vld [vmem:[#allocation8] sm:$0xff]   ;;  %s793_s4 = smov [#allocation10]  }
  0x56   :  { %572 = vmatprep.subr.bf16.mxu0 %v791_v0  ;;  %592 = vmatprep.subr.bf16.mxu1 %v791_v0  ;;  %v143_v50 = vsel %vm142_vm2, %v141_v40, %v140_v45  ;;  %v275_v51 = vrot.slane %v132_v31, 7  ;;  %v277_v52 = vrot.slane %v133_v32, 6  ;;  %v279_v53 = vrot.slane %v134_v33, 5  ;;  %v530_v30 = vld [vmem:[%s975_s6] ss:$0 sm:$0xff]  ;;  %s498_s9 = sshll.u32 %s793_s4, 4  ;;  %s499_s9 = int_to_ptr.vmem [resolvable:$true] %s498_s9 }
  0x57   :  { %v146_v55 = vsel %vm145_vm3, %v144_v41, %v143_v50  ;;  %v281_v56 = vrot.slane %v135_v34, 4  ;;  %v283_v57 = vrot.slane %v136_v36, 3  ;;  %v285_v58 = vrot.slane %v137_v37, 2  ;;  %s753_s10 = scalar_lea.vmem %s499_s9, 256  ;;  %p758_p5 = scmp.lt.s32.totalorder %s499_s9, %s499_s9 }
  0x58   :  { %v149_v59 = vsel %vm148_vm4, %v147_v42, %v146_v55  ;;  %v276_v60 = vsel %vm142_vm2, %v275_v51, %v274_v48  ;;  %p754_p4 = scmp.ne.s32.totalorder %s499_s9, %s753_s10  ;;  %p759_p6 = scmp.lt.s32.totalorder %s753_s10, %s753_s10 }
  0x59   :  { %573 = vmatpush3.bf16.msra.mxu0 %v643_v7  ;;  %593 = vmatpush3.bf16.msra.mxu1 %v644_v8  ;;  %v152_v61 = vsel %vm151_vm5, %v150_v43, %v149_v59  ;;  %v278_v62 = vsel %vm145_vm3, %v277_v52, %v276_v60 }
  0x5a   :  { %574 = vmatprep.subr.bf16.mxu0 %v791_v0  ;;  %594 = vmatprep.subr.bf16.mxu1 %v791_v0  ;;  %v155_v63 = vsel %vm154_vm6, %v153_v46, %v152_v61  ;;  %v280_v1 = vsel %vm148_vm4, %v279_v53, %v278_v62  ;;  %p760_p7 = por %p759_p6, %p758_p5 }
  0x5b   :  { %v158_v2 = vsel %vm157_vm7, %v156_v47, %v155_v63  ;;  %v282_v3 = vsel %vm151_vm5, %v281_v56, %v280_v1 }
  0x5c   :  { %v159_v4 = vpack.c.b16 %v158_v2, %v158_v2  ;;  %v284_v5 = vsel %vm154_vm6, %v283_v57, %v282_v3  ;;  %p761_p8 = pnand %p760_p7, %p754_p4 }
  0x5d   :  { %575 = vmatpush3.bf16.msra.mxu0 %v645_v9  ;;  %595 = vmatpush3.bf16.msra.mxu1 %v646_v10  ;;  %v286_v7 = vsel %vm157_vm7, %v285_v58, %v284_v5  ;;  %v654_v9 = vld [vmem:[#allocation8 + $0x8] sm:$0xff]   ;;  %v655_v10 = vld [vmem:[#allocation8 + $0x10] sm:$0xff]  }
  0x5e   :  { %576 = vmatprep.subr.bf16.mxu0 %v791_v0  ;;  %596 = vmatprep.subr.bf16.mxu1 %v791_v0  ;;  %v287_v8 = vpack.c.b16 %v286_v7, %v286_v7 }
  0x61   :  { %577 = vmatpush3.bf16.msra.mxu0 %v647_v11  ;;  %597 = vmatpush3.bf16.msra.mxu1 %v648_v26  ;;  %v656_v11 = vld [vmem:[#allocation8 + $0x18] sm:$0xff]  }
  0x62   :  { %578 = vmatprep.subr.bf16.mxu0 %v791_v0  ;;  %598 = vmatprep.subr.bf16.mxu1 %v791_v0 }
  0x65   :  { %579 = vmatpush3.bf16.msra.mxu0 %v649_v35  ;;  %599 = vmatpush3.bf16.msra.mxu1 %v650_v44 }
  0x66   :  { %580 = vmatprep.subr.bf16.mxu0 %v791_v0  ;;  %600 = vmatprep.subr.bf16.mxu1 %v791_v0 }
  0x69   :  { %581 = vmatpush3.bf16.msra.mxu0 %v651_v49  ;;  %601 = vmatpush3.bf16.msra.mxu1 %v652_v54 }
  0x6a   :  { %606 = vmatprep.subr.bf16.mxu0 %v791_v0 }
  0x6c   :  { %583 = vmatmul.mubr.bf16.vlgmr.msra.gmra.mrb[0].mxu0 %v159_v4  ;;  %603 = vmatmul.mubr.bf16.vlgmr.msra.gmra.mrb[0].mxu1 %v287_v8 }
  0x6d   :  { %607 = vmatpush3.bf16.msra.mxu0 %v653_v6  ;;  %622 = vmatprep.mubr.msk.bf16.mxu0 %vm792_vm0, %v791_v0 }
  0x6e   :  { %608 = vmatprep.subr.bf16.mxu0 %v791_v0 }
  0x71   :  { %609 = vmatpush3.bf16.msra.mxu0 %v654_v9 }
  0x72   :  { %610 = vmatprep.subr.bf16.mxu0 %v791_v0 }
  0x75   :  { %611 = vmatpush3.bf16.msra.mxu0 %v655_v10 }
  0x76   :  { %612 = vmatprep.subr.bf16.mxu0 %v791_v0 }
  0x79   :  { %613 = vmatpush3.bf16.msra.mxu0 %v656_v11 }
  0x7a   :  { %614 = vmatprep.subr.bf16.mxu0 %v791_v0 }
  0x7d   :  { %615 = vmatpush3.bf16.msra.mxu0 %v657_v12 }
  0x7e   :  { %616 = vmatprep.subr.bf16.mxu0 %v791_v0 }
  0x81   :  { %617 = vmatpush3.bf16.msra.mxu0 %v658_v13 }
  0x82   :  { %618 = vmatprep.subr.bf16.mxu0 %v791_v0 }
  0x85   :  { %619 = vmatpush3.bf16.msra.mxu0 %v659_v14 }
  0x86   :  { %620 = vmatprep.subr.bf16.mxu0 %v791_v0 }
  0x89   :  { %621 = vmatpush3.bf16.msra.mxu0 %v660_v15 }
 0x13f   :  { %v243_v18 = vpop.f32.mrb[0].mxu0  ;;  %v371_v20 = vpop.f32.mrb[0].mxu1 }
 0x140   :  { %v244_v19 = vadd.f32 %v512_v16, %v243_v18  ;;  %v584_v21 = vpop.f32.mrb[1].mxu0  ;;  %v372_v22 = vadd.f32 %v521_v17, %v371_v20  ;;  %v604_v23 = vpop.f32.mrb[1].mxu1 }
 0x141   :  { %v246_v24 = vpop.f32.mrb[2].mxu0  ;;  %v374_v25 = vpop.f32.mrb[2].mxu1 }
 0x142   :  { %661 = vtanh.f32 %v244_v19  ;;  %v585_v26 = vpop.f32.mrb[3].mxu0  ;;  %v605_v0 = vpop.f32.mrb[3].mxu1 }
 0x143   :  { %663 = vtanh.f32 %v372_v22 }
 0x14c   :  { %v662_v27 = vpop.eup %661 }
 0x14d   :  { %v664_v28 = vpop.eup %663 }
 0x14e   :  { %v378_v29 = vpack.c.bf16 %v664_v28, %v662_v27 }
 0x150   :  { %623 = vmatmul.mubr.bf16.vlgmr.msra.gmra.mrb[4].mxu0 %v378_v29 }
 0x223   :  { %v484_v31 = vpop.f32.mrb[4].mxu0 }
 0x224   :  { %v485_v32 = vadd.f32 %v530_v30, %v484_v31  ;;  %v624_v33 = vpop.f32.mrb[5].mxu0 }
 0x225   :  { %v487_v34 = vpop.f32.mrb[6].mxu0 }
 0x226   :  { %491 = vst [vmem:[#allocation10] sm:$0xff] %v485_v32  ;;  %v488_v35 = vadd.f32 %v530_v30, %v487_v34  ;;  %v625_v36 = vpop.f32.mrb[7].mxu0 }
 0x228   :  { %492 = vst [vmem:[#allocation10 + $0x8] sm:$0xff] %v488_v35 }
 0x229   :  { %764 = shalt.err (!%p761_p8)
}
 0x22a   :  { %s765_s14 = scalar_lea.hbm %s976_s7, 256 }
 0x22b   :  { %p766_p9 = scmp.ne.s32.totalorder %s976_s7, %s765_s14  ;;  %p769_p10 = scmp.lt.u32.totalorder %s765_s14, %s976_s7 }
 0x22d   :  { %p771_p11 = pnand %p769_p10, %p766_p9 }
 0x22f   :  { %774 = shalt.err (!%p771_p11)
}
 0x230   :  { %504 = dma.vmem_to_hbm [thread:$0]  %s499_s9, 256, %s976_s7, [#allocation4], %s787_s1, %s787_s1, %s788_s25  }
 0x231   :  { %781 = dma.done.wait [#allocation4], 256  }
 0x232   :  { %782 = vsyncadd [#allocation4], 4294967040 }
 0x233   :  { %508 = vsyncpa [#allocation3], 1 }
 0x234   :  { %509 = vsyncpa [#allocation6], 1 }
 0x235   :  { %510 = vsyncpa [#allocation9], 1 }
 0x236   :  { %511 = vsyncpa [#allocation4], 1 }

</bundles_post_ra>
